<compile_context>
chip_gen: v7x
topology: tpu7x:2x2x1
jax: 0.10.0
libtpu: 0.0.40
codegen_flags: <defaults>
</compile_context>

<pallas_src>
import functools

import jax
import jax.numpy as jnp
from jax.experimental import pallas as pl
from jax.experimental.pallas import tpu as pltpu


def _round_up(x, m):
    return ((x + m - 1) // m) * m


def _hinge_mc_v3_kernel(outputs_ref, labels_ref, out_ref, acc_ref, *,
                        margin, interclass_loss, batch, num_classes,
                        block_rows, mask_rows):
    i = pl.program_id(0)

    @pl.when(i == 0)
    def _():
        acc_ref[...] = jnp.zeros_like(acc_ref)

    x = outputs_ref[...].astype(jnp.float32)            # (TB, C), compute in f32
    lab = labels_ref[...]                                # (TB, 1) int32
    TB, C = x.shape

    # one-hot mask of the label position (VPU compare against a lane iota)
    classes = jax.lax.broadcasted_iota(jnp.int32, (TB, C), 1)
    mask = classes == lab                                # (TB, C) bool

    # binary hinge term, without materializing the +/-1 sign tensor
    combined = jnp.maximum(jnp.where(mask, margin - x, margin + x), 0.0)

    if interclass_loss:
        # MultiMarginLoss, p=1, weight=None, reduction='mean'
        x_y = jnp.sum(jnp.where(mask, x, 0.0), axis=1, keepdims=True)   # (TB, 1)
        hinge = jnp.maximum(margin - x_y + x, 0.0)
        combined = combined + jnp.where(mask, 0.0, hinge)               # exclude j == y_b

    if mask_rows:
        # zero contributions of rows padded beyond the true batch size
        row = jax.lax.broadcasted_iota(jnp.int32, (TB, C), 0) + i * block_rows
        combined = jnp.where(row < batch, combined, 0.0)

    # elementwise accumulate in f32 (no cross-lane reduce per step)
    acc_ref[...] += combined

    @pl.when(i == pl.num_programs(0) - 1)
    def _():
        # single fused reduction + single scale at the very end
        out_ref[0, 0] = jnp.sum(acc_ref[...]) * (1.0 / (batch * num_classes))


def hinge_mc_v3_loss(outputs, labels, margin=1.0, interclass_loss=True, block_rows=512):
    """outputs: (B, C) float (any dtype), labels: (B,) int -> scalar float32 loss."""
    B, C = outputs.shape

    # batch tile: multiple of 8 sublanes, capped by block_rows; C stays the full lane dim
    TB = max(8, min(_round_up(B, 8), _round_up(block_rows, 8)))
    B_pad = _round_up(B, TB)
    if B_pad != B:
        outputs = jnp.pad(outputs, ((0, B_pad - B), (0, 0)))
        labels = jnp.pad(labels, (0, B_pad - B))
    labels2d = labels.astype(jnp.int32).reshape(B_pad, 1)
    grid = (B_pad // TB,)

    kernel = functools.partial(
        _hinge_mc_v3_kernel,
        margin=float(margin),
        interclass_loss=bool(interclass_loss),
        batch=B,
        num_classes=C,
        block_rows=TB,
        mask_rows=(B_pad != B),
    )

    bytes_accessed = B_pad * C * outputs.dtype.itemsize + B_pad * 4 + 4

    out = pl.pallas_call(
        kernel,
        out_shape=jax.ShapeDtypeStruct((1, 1), jnp.float32),
        grid=grid,
        in_specs=[
            pl.BlockSpec((TB, C), lambda i: (i, 0)),        # outputs tile (VMEM)
            pl.BlockSpec((TB, 1), lambda i: (i, 0)),        # labels tile (VMEM, tiny)
        ],
        # scalar result lives in SMEM; written once at the last grid step
        out_specs=pl.BlockSpec(memory_space=pltpu.MemorySpace.SMEM),
        scratch_shapes=[pltpu.VMEM((TB, C), jnp.float32)],   # f32 running accumulator
        compiler_params=pltpu.CompilerParams(
            dimension_semantics=("arbitrary",)),             # reduction axis
        cost_estimate=pl.CostEstimate(
            flops=8 * B_pad * C, transcendentals=0, bytes_accessed=bytes_accessed),
    )(outputs, labels2d)
    return out[0, 0]


def _reference(outputs, labels, margin=1.0, interclass_loss=True):
    """Pure-JAX reference mirroring the PyTorch forward."""
    B, C = outputs.shape
    outputs = outputs.astype(jnp.float32)
    mask = jax.nn.one_hot(labels, C, dtype=jnp.bool_)
    sign = jnp.where(mask, 1.0, -1.0)
    bin_loss = jnp.maximum(margin - outputs * sign, 0.0).mean()
    if not interclass_loss:
        return bin_loss
    x_y = jnp.sum(jnp.where(mask, outputs, 0.0), axis=1, keepdims=True)
    hinge = jnp.maximum(margin - x_y + outputs, 0.0)
    hinge = jnp.where(mask, 0.0, hinge)
    intcls = (hinge.sum(axis=1) / C).mean()
    return bin_loss + intcls


if __name__ == "__main__":
    key = jax.random.PRNGKey(0)
    margin = 1.0

    # shapes consistent with the module's (batch, num_classifier) input
    B, C = 8, 16
    k_out, k_lab, k_out2, k_lab2 = jax.random.split(key, 4)
    outputs = jax.random.normal(k_out, (B, C), dtype=jnp.float32)
    labels = jax.random.randint(k_lab, (B,), 0, C, dtype=jnp.int32)

    loss = hinge_mc_v3_loss(outputs, labels, margin=margin, interclass_loss=True)
    jax.block_until_ready(loss)
    ref = _reference(outputs, labels, margin=margin, interclass_loss=True)
    assert jnp.allclose(loss, ref, rtol=1e-5, atol=1e-5), (loss, ref)

    # second config: non-multiple batch + tiny tile to exercise multi-step grid,
    # the running accumulator and the padded-row masking path
    B2, C2 = 13, 16
    outputs2 = jax.random.normal(k_out2, (B2, C2), dtype=jnp.float32)
    labels2 = jax.random.randint(k_lab2, (B2,), 0, C2, dtype=jnp.int32)
    loss2 = hinge_mc_v3_loss(outputs2, labels2, margin=margin,
                             interclass_loss=True, block_rows=8)
    jax.block_until_ready(loss2)
    ref2 = _reference(outputs2, labels2, margin=margin, interclass_loss=True)
    assert jnp.allclose(loss2, ref2, rtol=1e-5, atol=1e-5), (loss2, ref2)

    print("KERNEL_OK")
</pallas_src>

<mosaic_0001>
module attributes {stable_mosaic.version = 11 : i64} {
  func.func @_hinge_mc_v3_kernel(%arg0: i32, %arg1: memref<8x16xf32, #tpu.memory_space<vmem>>, %arg2: memref<8x1xi32, #tpu.memory_space<vmem>>, %arg3: memref<1x1xf32, #tpu.memory_space<smem>>, %arg4: memref<8x16xf32, #tpu.memory_space<vmem>>) attributes {dimension_semantics = [#tpu.dimension_semantics<arbitrary>], iteration_bounds = array<i64: 1>, scalar_prefetch = 0 : i64, scratch_operands = 1 : i64, tpu.core_type = #tpu.core_type<tc>, window_params = [{transform_indices = @transform_0, window_bounds = array<i64: 8, 16>}, {transform_indices = @transform_1, window_bounds = array<i64: 8, 1>}, {transform_indices = @transform_2, window_bounds = array<i64: 1, 1>}]} {
    %c0_i32 = arith.constant 0 : i32
    %0 = arith.cmpi eq, %arg0, %c0_i32 : i32
    %1 = arith.extui %0 : i1 to i32
    %c0_i32_0 = arith.constant 0 : i32
    %2 = arith.cmpi ne, %1, %c0_i32_0 : i32
    scf.if %2 {
      %cst_17 = arith.constant 0.000000e+00 : f32
      %34 = vector.broadcast %cst_17 : f32 to vector<8x16xf32>
      %c0_18 = arith.constant 0 : index
      %c0_19 = arith.constant 0 : index
      %35 = vector.load %arg4[%c0_18, %c0_19] : memref<8x16xf32, #tpu.memory_space<vmem>>, vector<8x16xf32>
      tpu.vector_store %arg4[%c0_18, %c0_19], %34 {strides = array<i32>} : memref<8x16xf32, #tpu.memory_space<vmem>>, vector<8x16xf32>,
    } else {
    }
    %c0 = arith.constant 0 : index
    %c0_1 = arith.constant 0 : index
    %3 = vector.load %arg1[%c0, %c0_1] : memref<8x16xf32, #tpu.memory_space<vmem>>, vector<8x16xf32>
    %c0_2 = arith.constant 0 : index
    %c0_3 = arith.constant 0 : index
    %4 = vector.load %arg2[%c0_2, %c0_3] : memref<8x1xi32, #tpu.memory_space<vmem>>, vector<8x1xi32>
    %5 = tpu.iota {dimensions = array<i32: 1>} : vector<8x16xi32>
    %6 = vector.broadcast %4 : vector<8x1xi32> to vector<8x16xi32>
    %7 = arith.cmpi eq, %5, %6 : vector<8x16xi32>
    %cst = arith.constant 1.000000e+00 : f32
    %8 = vector.broadcast %cst : f32 to vector<8x16xf32>
    %9 = arith.subf %8, %3 : vector<8x16xf32>
    %cst_4 = arith.constant 1.000000e+00 : f32
    %10 = vector.broadcast %cst_4 : f32 to vector<8x16xf32>
    %11 = arith.addf %10, %3 : vector<8x16xf32>
    %12 = arith.select %7, %9, %11 : vector<8x16xi1>, vector<8x16xf32>
    %cst_5 = arith.constant 0.000000e+00 : f32
    %13 = vector.broadcast %cst_5 : f32 to vector<8x16xf32>
    %14 = arith.maximumf %12, %13 : vector<8x16xf32>
    %cst_6 = arith.constant 0.000000e+00 : f32
    %15 = vector.broadcast %cst_6 : f32 to vector<8x16xf32>
    %16 = arith.select %7, %3, %15 : vector<8x16xi1>, vector<8x16xf32>
    %cst_7 = arith.constant dense<0.000000e+00> : vector<8xf32>
    %17 = vector.multi_reduction <add>, %16, %cst_7 [1] : vector<8x16xf32> to vector<8xf32>
    %18 = vector.shape_cast %17 : vector<8xf32> to vector<8x1xf32>
    %cst_8 = arith.constant 1.000000e+00 : f32
    %19 = vector.broadcast %cst_8 : f32 to vector<8x1xf32>
    %20 = arith.subf %19, %18 : vector<8x1xf32>
    %21 = vector.broadcast %20 : vector<8x1xf32> to vector<8x16xf32>
    %22 = arith.addf %21, %3 : vector<8x16xf32>
    %cst_9 = arith.constant 0.000000e+00 : f32
    %23 = vector.broadcast %cst_9 : f32 to vector<8x16xf32>
    %24 = arith.maximumf %22, %23 : vector<8x16xf32>
    %cst_10 = arith.constant 0.000000e+00 : f32
    %25 = vector.broadcast %cst_10 : f32 to vector<8x16xf32>
    %26 = arith.select %7, %25, %24 : vector<8x16xi1>, vector<8x16xf32>
    %27 = arith.addf %14, %26 : vector<8x16xf32>
    %c0_11 = arith.constant 0 : index
    %c0_12 = arith.constant 0 : index
    %28 = vector.load %arg4[%c0_11, %c0_12] : memref<8x16xf32, #tpu.memory_space<vmem>>, vector<8x16xf32>
    %29 = arith.addf %28, %27 : vector<8x16xf32>
    %c0_13 = arith.constant 0 : index
    %c0_14 = arith.constant 0 : index
    %30 = vector.load %arg4[%c0_13, %c0_14] : memref<8x16xf32, #tpu.memory_space<vmem>>, vector<8x16xf32>
    tpu.vector_store %arg4[%c0_13, %c0_14], %29 {strides = array<i32>} : memref<8x16xf32, #tpu.memory_space<vmem>>, vector<8x16xf32>,
    %c0_i32_15 = arith.constant 0 : i32
    %31 = arith.cmpi eq, %arg0, %c0_i32_15 : i32
    %32 = arith.extui %31 : i1 to i32
    %c0_i32_16 = arith.constant 0 : i32
    %33 = arith.cmpi ne, %32, %c0_i32_16 : i32
    scf.if %33 {
      %c0_17 = arith.constant 0 : index
      %c0_18 = arith.constant 0 : index
      %34 = vector.load %arg4[%c0_17, %c0_18] : memref<8x16xf32, #tpu.memory_space<vmem>>, vector<8x16xf32>
      %35 = vector.shape_cast %34 : vector<8x16xf32> to vector<1x8x16xf32>
      %cst_19 = arith.constant dense<0.000000e+00> : vector<1xf32>
      %36 = vector.multi_reduction <add>, %35, %cst_19 [1, 2] : vector<1x8x16xf32> to vector<1xf32>
      %37 = vector.shape_cast %36 : vector<1xf32> to vector<1x1x1xf32>
      %38 = vector.extract %37[0, 0, 0] : f32 from vector<1x1x1xf32>
      %cst_20 = arith.constant 7.812500e-03 : f32
      %39 = arith.mulf %38, %cst_20 : f32
      %c0_21 = arith.constant 0 : index
      %c0_22 = arith.constant 0 : index
      %40 = memref.load %arg3[%c0_21, %c0_22] : memref<1x1xf32, #tpu.memory_space<smem>>
      memref.store %39, %arg3[%c0_21, %c0_22] : memref<1x1xf32, #tpu.memory_space<smem>>
    } else {
    }
    return
  }
  func.func @transform_0(%arg0: i32) -> (i32, i32) {
    %c0_i32 = arith.constant 0 : i32
    %c0_i32_0 = arith.constant 0 : i32
    return %arg0, %c0_i32 : i32, i32
  }
  func.func @transform_1(%arg0: i32) -> (i32, i32) {
    %c0_i32 = arith.constant 0 : i32
    %c0_i32_0 = arith.constant 0 : i32
    return %arg0, %c0_i32 : i32, i32
  }
  func.func @transform_2(%arg0: i32) -> (i32, i32) {
    %c0_i32 = arith.constant 0 : i32
    %c0_i32_0 = arith.constant 0 : i32
    %c0_i32_1 = arith.constant 0 : i32
    return %c0_i32, %c0_i32_0 : i32, i32
  }
}

</mosaic_0001>

<bundles_post_ra>
// kernel: tpu_custom_call.1
= control target key start
LH: loop header
LB: loop body
LE: loop exit
PB: predicated region body
PF: predicated region fallthrough
CT: control target
= control target key end

     0   :  { %s131_s0 = inlined_call_operand.vmem [shape: f32[8,16], index: 0, kind: input, shape index: {}]   ;;  %s132_s1 = inlined_call_operand.vmem [shape: s32[8,1], index: 1, kind: input, shape index: {}]   ;;  %s133_s2 = inlined_call_operand.hbm [shape: f32[1,1], index: 2, kind: output, shape index: {}]  }
   0x1   :  { %v19_v0 = vld [vmem:[%s132_s1] sm:$0xff] }
   0x2   :  { %7 = vsyncpa [#allocation4], 0  ;;  %v91_v1 = vmov 0   ;;  %vm16_vm0 = vcmask 130048   ;;  %v92_v2 = vmov 0.0   ;;  %v20_v3 = vlaneseq  ;;  %v18_v6 = vld [vmem:[%s131_s0] sm:$0xff] }
   0x3   :  { %78 = vset.pattern.permute.xlu0 %v91_v1  ;;  %17 = vst.msk [vmem:[#allocation2] sm:$0xff] %vm16_vm0, %v92_v2  ;;  %v26_v9 = vsub.f32 1.0, %v18_v6  ;;  %v27_v10 = vadd.f32 1.0, %v18_v6  ;;  %s79_s15 = scalar_lea.hbm %s133_s2, 16 }
   0x4   :  { %23 = vperm.xlu0 %78, %v19_v0   ;;  %v21_v4 = vand.u32 127, %v20_v3  ;;  %p80_p0 = scmp.ne.s32.totalorder %s133_s2, %s79_s15  ;;  %p83_p1 = scmp.lt.u32.totalorder %s79_s15, %s133_s2 }
   0x6   :  { %p85_p2 = pnand %p83_p1, %p80_p0 }
   0xa   :  { %v40_v18 = vld [vmem:[#allocation2] sm:$0xff] }
  0x83   :  { %v24_v5 = vpop.permute.xlu0 %23 }
  0x84   :  { %vm25_vm1 = vcmp.eq.s32.totalorder %v21_v4, %v24_v5 }
  0x85   :  { %v30_v7 = vsel %vm25_vm1, %v18_v6, 0.0  ;;  %v28_v13 = vsel %vm25_vm1, %v26_v9, %v27_v10 }
  0x86   :  { %v32_v8 = vsel %vm16_vm0, %v30_v7, 0.0  ;;  %v29_v16 = vmax.f32 %v28_v13, 0.0 }
  0x87   :  { %33 = vadd.xlane.f32.xlu0 %v32_v8 }
 0x114   :  { %v34_v11 = vpop.xlane.xlu0 %33 }
 0x115   :  { %v35_v12 = vsub.f32 1.0, %v34_v11 }
 0x117   :  { %v36_v14 = vadd.f32 %v35_v12, %v18_v6 }
 0x119   :  { %v37_v15 = vmax.f32 %v36_v14, 0.0 }
 0x11b   :  { %v38_v17 = vsel %vm25_vm1, 0.0, %v37_v15 }
 0x11c   :  { %v39_v19 = vadd.f32 %v38_v17, %v29_v16 }
 0x11e   :  { %v41_v20 = vadd.f32 %v40_v18, %v39_v19 }
 0x120   :  { %42 = vst.msk [vmem:[#allocation2] sm:$0xff] %vm16_vm0, %v41_v20 }
 0x127   :  { %v46_v21 = vld [vmem:[#allocation2] sm:$0xff] }
 0x128   :  { %v47_v22 = vsel %vm16_vm0, %v46_v21, 0.0 }
 0x129   :  { %48 = vadd.xlane.f32.xlu1 %v47_v22 }
 0x1b6   :  { %v49_v23 = vpop.xlane.xlu1 %48 }
 0x1b7   :  { %v50_v24 = vrot.slane %v49_v23, 4 }
 0x1b9   :  { %v51_v25 = vadd.f32 %v50_v24, %v49_v23 }
 0x1bb   :  { %v52_v26 = vrot.slane %v51_v25, 2 }
 0x1bd   :  { %v53_v27 = vadd.f32 %v52_v26, %v51_v25 }
 0x1bf   :  { %v54_v28 = vrot.slane %v53_v27, 1 }
 0x1c1   :  { %v55_v29 = vadd.f32 %v54_v28, %v53_v27 }
 0x1c3   :  { %73 = vpush %v55_v29 }
 0x1f4   :  { %s74_s0 = spop %73 }
 0x1f5   :  { %s57_s1 = smul.f32 0.0078125, %s74_s0 }
 0x1f7   :  { %59 = sst [smem:[#allocation3]] %s57_s1 }
 0x1f8   :  { %88 = shalt.err (!%p85_p2)
}
 0x1f9   :  { %s93_s20 = smov [#allocation3]  }
 0x1fa   :  { %67 = dma.smem_to_hbm %s93_s20, 16, %s133_s2, [#allocation4]  }
 0x1fb   :  { %89 = dma.done.wait [#allocation4], 16  }
 0x1fc   :  { %90 = vsyncadd [#allocation4], 4294967280 }
 0x1fd   :  { %71 = sfence }
 0x1fe   :  { %72 = vsyncpa [#allocation4], 1 }

</bundles_post_ra>
